<compile_context>
chip_gen: v6e
topology: v6e:2x2x1
jax: 0.10.0
libtpu: 0.0.40
codegen_flags: <defaults>
</compile_context>

<pallas_src>
import functools

import jax
import jax.numpy as jnp
from jax.experimental import pallas as pl
from jax.experimental.pallas import tpu as pltpu


def _multifc_kernel(num_hidden_layers,
                    xT_ref, w_in_ref, b_in_ref,
                    w_hid_ref, b_hid_ref,
                    w_cat_ref, b_cat_ref,
                    outT_ref):
    """Fused MultiFC forward for one batch tile, batch on the lane axis.

    Layout (transposed w.r.t. the PyTorch convention):
      xT    [F, Bt]    activations, batch on lanes (bf16)
      w_*   [out, in]  native PyTorch nn.Linear layout (bf16)
      b_*   [out, 1]   column biases (f32)
      outT  [out_size, Bt] (f32)
    """
    xT = xT_ref[...]                                   # [F, Bt] bf16
    cdt = xT.dtype

    # fc_input + tanh (f32 accumulate, f32 tanh on EUP)
    h = jnp.tanh(
        jnp.dot(w_in_ref[...], xT, preferred_element_type=jnp.float32)
        + b_in_ref[...])                               # [H, Bt] f32

    # hidden fc_layers + tanh (static unroll; bias table hoisted to one load)
    b_hid = b_hid_ref[...]                             # [L, H, 1] f32
    for i in range(num_hidden_layers):
        h = jnp.tanh(
            jnp.dot(w_hid_ref[i], h.astype(cdt),
                    preferred_element_type=jnp.float32)
            + b_hid[i])                                # [H, Bt] f32

    # fc_output fused with the short_cut es():
    #   out = [w_out | w_es] @ [h ; x] + (b_out + b_es)
    hx = jnp.concatenate([h.astype(cdt), xT], axis=0)  # [H+F, Bt] bf16
    outT = (jnp.dot(w_cat_ref[...], hx, preferred_element_type=jnp.float32)
            + b_cat_ref[...])                          # [out, Bt] f32

    outT_ref[...] = outT.astype(outT_ref.dtype)


def _pick_batch_tile(padded_batch):
    """Largest lane-aligned tile that still leaves >= 2 grid steps (v7x TCs)."""
    for t in (2048, 1024, 512, 256, 128):
        if padded_batch % t == 0 and padded_batch // t >= 2:
            return t
    return padded_batch


def multifc_pallas(x, kparams, num_hidden_layers, batch_tile=None):
    """x: [B, input_size] f32.  kparams: dict from prepare_kernel_params."""
    B, F = x.shape
    out_size = kparams["w_cat"].shape[0]
    compute_dtype = kparams["w_cat"].dtype

    # Pad the batch up to a multiple of 128 so it maps cleanly onto lanes.
    Bp = max(128, ((B + 127) // 128) * 128)
    if Bp != B:
        x = jnp.pad(x, ((0, Bp - B), (0, 0)))
    if batch_tile is None:
        batch_tile = _pick_batch_tile(Bp)
    assert Bp % batch_tile == 0
    assert batch_tile % 128 == 0 or batch_tile == Bp

    # Layout plumbing only: batch onto the lane axis, activations to bf16.
    xT = jnp.swapaxes(x, 0, 1).astype(compute_dtype)   # [F, Bp]

    kernel = functools.partial(_multifc_kernel, num_hidden_layers)

    # Whole (tiny) weight/bias tensors resident each grid step; only the batch
    # is tiled.  NOTE: if hidden_size is ever scaled up, single-buffer these
    # constant-index specs (pipeline_mode=pl.Buffered(1)) and/or raise
    # vmem_limit_bytes further (v7x: 64 MiB VMEM; v5e default scoped 16 MiB).
    def full(a):
        nd = a.ndim
        return pl.BlockSpec(a.shape, lambda b: (0,) * nd)

    outT = pl.pallas_call(
        kernel,
        out_shape=jax.ShapeDtypeStruct((out_size, Bp), jnp.float32),
        grid_spec=pltpu.PrefetchScalarGridSpec(
            num_scalar_prefetch=0,
            grid=(Bp // batch_tile,),
            in_specs=[
                pl.BlockSpec((F, batch_tile), lambda b: (0, b)),
                full(kparams["w_in"]),
                full(kparams["b_in"]),
                full(kparams["w_hid"]),
                full(kparams["b_hid"]),
                full(kparams["w_cat"]),
                full(kparams["b_cat"]),
            ],
            out_specs=pl.BlockSpec((out_size, batch_tile), lambda b: (0, b)),
        ),
        compiler_params=pltpu.CompilerParams(
            dimension_semantics=("parallel",),
            vmem_limit_bytes=32 * 1024 * 1024,
        ),
    )(xT, kparams["w_in"], kparams["b_in"], kparams["w_hid"],
      kparams["b_hid"], kparams["w_cat"], kparams["b_cat"])

    # Back to the PyTorch [B, out] convention, dropping batch padding.
    return jnp.swapaxes(outT, 0, 1)[:B]


def init_params(key, input_size, hidden_size, output_size, num_hidden_layers):
    """Deterministic PyTorch-nn.Linear-style init; native [out, in] weights."""
    def linear(k, fan_in, fan_out):
        kw, kb = jax.random.split(k)
        bound = 1.0 / (fan_in ** 0.5)
        w = jax.random.uniform(kw, (fan_out, fan_in), jnp.float32, -bound, bound)
        b = jax.random.uniform(kb, (fan_out,), jnp.float32, -bound, bound)
        return w, b

    keys = jax.random.split(key, 3 + num_hidden_layers)
    w_in, b_in = linear(keys[0], input_size, hidden_size)
    w_out, b_out = linear(keys[1], hidden_size, output_size)
    w_es, b_es = linear(keys[2], input_size, output_size)
    w_hid, b_hid = [], []
    for i in range(num_hidden_layers):
        w, b = linear(keys[3 + i], hidden_size, hidden_size)
        w_hid.append(w)
        b_hid.append(b)
    return dict(w_in=w_in, b_in=b_in,
                w_hid=jnp.stack(w_hid), b_hid=jnp.stack(b_hid),  # [L,H,H],[L,H]
                w_out=w_out, b_out=b_out, w_es=w_es, b_es=b_es)


def prepare_kernel_params(p, compute_dtype=jnp.bfloat16):
    """Kernel-side packing: bf16 weights, column biases, fused output/shortcut."""
    return dict(
        w_in=p["w_in"].astype(compute_dtype),                         # [H, F]
        b_in=p["b_in"][:, None].astype(jnp.float32),                  # [H, 1]
        w_hid=p["w_hid"].astype(compute_dtype),                       # [L, H, H]
        b_hid=p["b_hid"][:, :, None].astype(jnp.float32),             # [L, H, 1]
        w_cat=jnp.concatenate([p["w_out"], p["w_es"]], axis=1)
                 .astype(compute_dtype),                              # [out, H+F]
        b_cat=(p["b_out"] + p["b_es"])[:, None].astype(jnp.float32),  # [out, 1]
    )


def multifc_ref(x, p, num_hidden_layers):
    """Pure-JAX f32 reference mirroring the PyTorch forward."""
    h = jnp.tanh(x @ p["w_in"].T + p["b_in"])
    for i in range(num_hidden_layers):
        h = jnp.tanh(h @ p["w_hid"][i].T + p["b_hid"][i])
    out = h @ p["w_out"].T + p["b_out"]
    out = out + x @ p["w_es"].T + p["b_es"]
    return out


if __name__ == "__main__":
    # Small shapes consistent with the module's forward; batch chosen as a
    # multiple of 128 so it is lane-dense and gives a 2-step "parallel" grid.
    batch = 256
    input_size = 32
    hidden_size = 32
    output_size = 16
    num_hidden_layers = 2

    key = jax.random.PRNGKey(0)
    kx, kp = jax.random.split(key)
    x = jax.random.normal(kx, (batch, input_size), jnp.float32)
    params = init_params(kp, input_size, hidden_size, output_size,
                         num_hidden_layers)
    kparams = prepare_kernel_params(params)

    out = multifc_pallas(x, kparams, num_hidden_layers)
    out = jax.block_until_ready(out)

    ref = multifc_ref(x, params, num_hidden_layers)
    assert out.shape == (batch, output_size)
    # bf16 compute (f32 accumulate) vs f32 reference -> loosened tolerance.
    assert jnp.allclose(out, ref, atol=5e-2, rtol=5e-2), \
        f"max err {jnp.max(jnp.abs(out - ref))}"

    print("KERNEL_OK")
</pallas_src>

<mosaic_0001>
module attributes {stable_mosaic.version = 11 : i64} {
  func.func @_multifc_kernel(%arg0: i32, %arg1: memref<32x128xbf16, #tpu.memory_space<vmem>>, %arg2: memref<32x32xbf16, #tpu.memory_space<vmem>>, %arg3: memref<32x1xf32, #tpu.memory_space<vmem>>, %arg4: memref<2x32x32xbf16, #tpu.memory_space<vmem>>, %arg5: memref<2x32x1xf32, #tpu.memory_space<vmem>>, %arg6: memref<16x64xbf16, #tpu.memory_space<vmem>>, %arg7: memref<16x1xf32, #tpu.memory_space<vmem>>, %arg8: memref<16x128xf32, #tpu.memory_space<vmem>>) attributes {dimension_semantics = [#tpu.dimension_semantics<parallel>], iteration_bounds = array<i64: 2>, scalar_prefetch = 0 : i64, scratch_operands = 0 : i64, tpu.core_type = #tpu.core_type<tc>, window_params = [{transform_indices = @transform_0, window_bounds = array<i64: 32, 128>}, {pipeline_mode = #tpu.pipeline_mode<synchronous>, transform_indices = @transform_1, window_bounds = array<i64: 32, 32>}, {pipeline_mode = #tpu.pipeline_mode<synchronous>, transform_indices = @transform_2, window_bounds = array<i64: 32, 1>}, {pipeline_mode = #tpu.pipeline_mode<synchronous>, transform_indices = @transform_3, window_bounds = array<i64: 2, 32, 32>}, {pipeline_mode = #tpu.pipeline_mode<synchronous>, transform_indices = @transform_4, window_bounds = array<i64: 2, 32, 1>}, {pipeline_mode = #tpu.pipeline_mode<synchronous>, transform_indices = @transform_5, window_bounds = array<i64: 16, 64>}, {pipeline_mode = #tpu.pipeline_mode<synchronous>, transform_indices = @transform_6, window_bounds = array<i64: 16, 1>}, {transform_indices = @transform_7, window_bounds = array<i64: 16, 128>}]} {
    %c0 = arith.constant 0 : index
    %c0_0 = arith.constant 0 : index
    %0 = vector.load %arg1[%c0, %c0_0] : memref<32x128xbf16, #tpu.memory_space<vmem>>, vector<32x128xbf16>
    %c0_1 = arith.constant 0 : index
    %c0_2 = arith.constant 0 : index
    %1 = vector.load %arg2[%c0_1, %c0_2] : memref<32x32xbf16, #tpu.memory_space<vmem>>, vector<32x32xbf16>
    %cst = arith.constant dense<0.000000e+00> : vector<32x128xf32>
    %2 = tpu.matmul %1, %0, %cst {dimension_numbers = #tpu.dot_dimension_numbers<[1], [0], [0], [1], [0, 0, 1, 1], [], []>} : vector<32x32xbf16>, vector<32x128xbf16>, vector<32x128xf32> -> vector<32x128xf32>
    %c0_3 = arith.constant 0 : index
    %c0_4 = arith.constant 0 : index
    %3 = vector.load %arg3[%c0_3, %c0_4] : memref<32x1xf32, #tpu.memory_space<vmem>>, vector<32x1xf32>
    %4 = vector.broadcast %3 : vector<32x1xf32> to vector<32x128xf32>
    %5 = arith.addf %2, %4 : vector<32x128xf32>
    %6 = math.tanh %5 : vector<32x128xf32>
    %c0_5 = arith.constant 0 : index
    %c0_6 = arith.constant 0 : index
    %c0_7 = arith.constant 0 : index
    %7 = vector.load %arg5[%c0_5, %c0_6, %c0_7] : memref<2x32x1xf32, #tpu.memory_space<vmem>>, vector<2x32x1xf32>
    %c0_8 = arith.constant 0 : index
    %c0_9 = arith.constant 0 : index
    %c0_10 = arith.constant 0 : index
    %8 = vector.load %arg4[%c0_8, %c0_9, %c0_10] : memref<2x32x32xbf16, #tpu.memory_space<vmem>>, vector<1x32x32xbf16>
    %9 = vector.shape_cast %8 : vector<1x32x32xbf16> to vector<32x32xbf16>
    %10 = arith.truncf %6 : vector<32x128xf32> to vector<32x128xbf16>
    %cst_11 = arith.constant dense<0.000000e+00> : vector<32x128xf32>
    %11 = tpu.matmul %9, %10, %cst_11 {dimension_numbers = #tpu.dot_dimension_numbers<[1], [0], [0], [1], [0, 0, 1, 1], [], []>} : vector<32x32xbf16>, vector<32x128xbf16>, vector<32x128xf32> -> vector<32x128xf32>
    %12 = vector.extract_strided_slice %7 {offsets = [0, 0, 0], sizes = [1, 32, 1], strides = [1, 1, 1]} : vector<2x32x1xf32> to vector<1x32x1xf32>
    %13 = vector.shape_cast %12 : vector<1x32x1xf32> to vector<32x1xf32>
    %14 = vector.broadcast %13 : vector<32x1xf32> to vector<32x128xf32>
    %15 = arith.addf %11, %14 : vector<32x128xf32>
    %16 = math.tanh %15 : vector<32x128xf32>
    %c1 = arith.constant 1 : index
    %c0_12 = arith.constant 0 : index
    %c0_13 = arith.constant 0 : index
    %17 = vector.load %arg4[%c1, %c0_12, %c0_13] : memref<2x32x32xbf16, #tpu.memory_space<vmem>>, vector<1x32x32xbf16>
    %18 = vector.shape_cast %17 : vector<1x32x32xbf16> to vector<32x32xbf16>
    %19 = arith.truncf %16 : vector<32x128xf32> to vector<32x128xbf16>
    %cst_14 = arith.constant dense<0.000000e+00> : vector<32x128xf32>
    %20 = tpu.matmul %18, %19, %cst_14 {dimension_numbers = #tpu.dot_dimension_numbers<[1], [0], [0], [1], [0, 0, 1, 1], [], []>} : vector<32x32xbf16>, vector<32x128xbf16>, vector<32x128xf32> -> vector<32x128xf32>
    %21 = vector.extract_strided_slice %7 {offsets = [1, 0, 0], sizes = [1, 32, 1], strides = [1, 1, 1]} : vector<2x32x1xf32> to vector<1x32x1xf32>
    %22 = vector.shape_cast %21 : vector<1x32x1xf32> to vector<32x1xf32>
    %23 = vector.broadcast %22 : vector<32x1xf32> to vector<32x128xf32>
    %24 = arith.addf %20, %23 : vector<32x128xf32>
    %25 = math.tanh %24 : vector<32x128xf32>
    %26 = arith.truncf %25 : vector<32x128xf32> to vector<32x128xbf16>
    %27 = tpu.concatenate %26, %0 in 0 : vector<32x128xbf16>, vector<32x128xbf16> -> vector<64x128xbf16>
    %c0_15 = arith.constant 0 : index
    %c0_16 = arith.constant 0 : index
    %28 = vector.load %arg6[%c0_15, %c0_16] : memref<16x64xbf16, #tpu.memory_space<vmem>>, vector<16x64xbf16>
    %cst_17 = arith.constant dense<0.000000e+00> : vector<16x128xf32>
    %29 = tpu.matmul %28, %27, %cst_17 {dimension_numbers = #tpu.dot_dimension_numbers<[1], [0], [0], [1], [0, 0, 1, 1], [], []>} : vector<16x64xbf16>, vector<64x128xbf16>, vector<16x128xf32> -> vector<16x128xf32>
    %c0_18 = arith.constant 0 : index
    %c0_19 = arith.constant 0 : index
    %30 = vector.load %arg7[%c0_18, %c0_19] : memref<16x1xf32, #tpu.memory_space<vmem>>, vector<16x1xf32>
    %31 = vector.broadcast %30 : vector<16x1xf32> to vector<16x128xf32>
    %32 = arith.addf %29, %31 : vector<16x128xf32>
    %c0_20 = arith.constant 0 : index
    %c0_21 = arith.constant 0 : index
    %33 = vector.load %arg8[%c0_20, %c0_21] : memref<16x128xf32, #tpu.memory_space<vmem>>, vector<16x128xf32>
    tpu.vector_store %arg8[%c0_20, %c0_21], %32 {strides = array<i32>} : memref<16x128xf32, #tpu.memory_space<vmem>>, vector<16x128xf32>,
    return
  }
  func.func @transform_0(%arg0: i32) -> (i32, i32) {
    %c0_i32 = arith.constant 0 : i32
    %c0_i32_0 = arith.constant 0 : i32
    return %c0_i32, %arg0 : i32, i32
  }
  func.func @transform_1(%arg0: i32) -> (i32, i32) {
    %c0_i32 = arith.constant 0 : i32
    %c0_i32_0 = arith.constant 0 : i32
    %c0_i32_1 = arith.constant 0 : i32
    return %c0_i32, %c0_i32_0 : i32, i32
  }
  func.func @transform_2(%arg0: i32) -> (i32, i32) {
    %c0_i32 = arith.constant 0 : i32
    %c0_i32_0 = arith.constant 0 : i32
    %c0_i32_1 = arith.constant 0 : i32
    return %c0_i32, %c0_i32_0 : i32, i32
  }
  func.func @transform_3(%arg0: i32) -> (i32, i32, i32) {
    %c0_i32 = arith.constant 0 : i32
    %c0_i32_0 = arith.constant 0 : i32
    %c0_i32_1 = arith.constant 0 : i32
    %c0_i32_2 = arith.constant 0 : i32
    return %c0_i32, %c0_i32_0, %c0_i32_1 : i32, i32, i32
  }
  func.func @transform_4(%arg0: i32) -> (i32, i32, i32) {
    %c0_i32 = arith.constant 0 : i32
    %c0_i32_0 = arith.constant 0 : i32
    %c0_i32_1 = arith.constant 0 : i32
    %c0_i32_2 = arith.constant 0 : i32
    return %c0_i32, %c0_i32_0, %c0_i32_1 : i32, i32, i32
  }
  func.func @transform_5(%arg0: i32) -> (i32, i32) {
    %c0_i32 = arith.constant 0 : i32
    %c0_i32_0 = arith.constant 0 : i32
    %c0_i32_1 = arith.constant 0 : i32
    return %c0_i32, %c0_i32_0 : i32, i32
  }
  func.func @transform_6(%arg0: i32) -> (i32, i32) {
    %c0_i32 = arith.constant 0 : i32
    %c0_i32_0 = arith.constant 0 : i32
    %c0_i32_1 = arith.constant 0 : i32
    return %c0_i32, %c0_i32_0 : i32, i32
  }
  func.func @transform_7(%arg0: i32) -> (i32, i32) {
    %c0_i32 = arith.constant 0 : i32
    %c0_i32_0 = arith.constant 0 : i32
    return %c0_i32, %arg0 : i32, i32
  }
}

</mosaic_0001>

<bundles_post_ra>
// kernel: tpu_custom_call.1
= control target key start
LH: loop header
LB: loop body
LE: loop exit
PB: predicated region body
PF: predicated region fallthrough
CT: control target
= control target key end

     0   :  { %12 = vsyncpa [#allocation4], 0  ;;  %s1263_s0 = inlined_call_operand.vmem [shape: bf16[32,256], index: 0, kind: input, shape index: {}]   ;;  %s1264_s1 = inlined_call_operand.vmem [shape: bf16[32,32], index: 1, kind: input, shape index: {}]   ;;  %s1265_s2 = inlined_call_operand.vmem [shape: f32[32,1], index: 2, kind: input, shape index: {}]   ;;  %s1266_s3 = inlined_call_operand.vmem [shape: bf16[2,32,32], index: 3, kind: input, shape index: {}]   ;;  %s1267_s4 = inlined_call_operand.vmem [shape: f32[2,32,1], index: 4, kind: input, shape index: {}]   ;;  %s1268_s5 = inlined_call_operand.vmem [shape: bf16[16,64], index: 5, kind: input, shape index: {}]   ;;  %s1269_s6 = inlined_call_operand.vmem [shape: f32[16,1], index: 6, kind: input, shape index: {}]   ;;  %s1270_s7 = inlined_call_operand.hbm [shape: f32[16,256], index: 7, kind: output, shape index: {}]  }
   0x1   :  { %14 = vsyncpa [#allocation4 + $0x1], 0  ;;  %s1069_s24 = smov 0   ;;  %s1071_s25 = smov 0  }
   0x2   :  { %s1073_s26 = smov 0   ;;  %s1075_s27 = smov 0  }
   0x3 LB: > { %s794_s28 = sadd.s32 4294967295, %s1020_s27   ;;  %s795_s29 = sadd.s32 4294967294, %s1020_s27   ;;  %s1020_s27 = sphi %s1075_s27, %s1276_s27   ;;  %s1016_s26 = sphi %s1073_s26, %s1275_s26   ;;  %s1012_s25 = sphi %s1071_s25, %s1274_s25   ;;  %s1008_s24 = sphi %s1069_s24, %s1273_s24  }
   0x4   : > { %s1092_s30 = sadd.s32 1, %s1020_s27   ;;  %s27_s8 = sadd.s32 1, %s1016_s26 }
   0x5   : > { %s24_s9 = ssub.s32 %s1020_s27, %s1092_s30  ;;  %p34_p0 = scmp.ne.s32.totalorder %s1016_s26, %s1012_s25 }
   0x6   : > { %p25_p1 = scmp.eq.s32.totalorder %s24_s9, 0  ;;  %p35_p2 = scmp.eq.s32.totalorder %s1020_s27, 0 }
   0x7   : > { %p190_p3 = scmp.eq.s32.totalorder %s794_s28, 1  ;;  %p195_p4 = scmp.ne.s32.totalorder %s1012_s25, %s1008_s24 }
   0x8   : > { %s1105_s10 = scalar_select %p25_p1, %s1016_s26, %s27_s8  }
   0x9   : > { %p36_p5 = por %p35_p2, %p34_p0  ;;  %p1107_p6 = por %p190_p3, %p34_p0 }
   0xa   : > { %p196_p7 = scmp.eq.s32.totalorder %s795_s29, 1  ;;  %p797_p9 = scmp.ge.s32.totalorder %s1020_s27, 2 }
   0xc   : > { %p1111_p8 = por %p196_p7, %p195_p4  ;;  %230 = sbr.rel (%p797_p9) target bundleno = 23 (0x17), region = 40 }
  0x11   : > { %233 = sbr.rel (!%p36_p5) target bundleno = 23 (0x17), region = 44  ;;  %s235_s13 = sand.u32 (%p36_p5), 1, %s1016_s26  }
  0x12   : > { %s799_s14 = sshll.u32 (%p36_p5), %s1020_s27, 2  ;;  %s798_s15 = sshll.u32 (%p36_p5), %s235_s13, 4 }
  0x13   : > { %s239_s18 = scalar_lea.vmem (%p36_p5), %s1263_s0, %s799_s14  ;;  %s237_s19 = scalar_lea.vmem (%p36_p5), [#allocation2], %s798_s15 }
  0x14   : > { %v256_v0 = vld [vmem:[%s239_s18] sm:$0xf] (%p36_p5)  ;;  %v258_v1 = vld [vmem:[%s239_s18 + $0x8] sm:$0xf] (%p36_p5)  ;;  %v260_v2 = vld [vmem:[%s239_s18 + $0x10] sm:$0xf] (%p36_p5) }
  0x15   : > { %257 = vst [vmem:[%s237_s19] sm:$0xf] (%p36_p5), %v256_v0  ;;  %259 = vst [vmem:[%s237_s19 + $0x4] sm:$0xf] (%p36_p5), %v258_v1  ;;  %v262_v3 = vld [vmem:[%s239_s18 + $0x18] sm:$0xf] (%p36_p5) }
  0x16   : > { %261 = vst [vmem:[%s237_s19 + $0x8] sm:$0xf] %v260_v2  ;;  %263 = vst [vmem:[%s237_s19 + $0xc] sm:$0xf] %v262_v3 }
  0x17 PF: > { %p800_p10 = scmp.ge.s32.totalorder %s1020_s27, 1  ;;  %p294_p11 = scmp.lt.s32.totalorder %s1020_s27, 3 }
  0x19   : > { %p295_p12 = pnand %p800_p10, %p294_p11 }
  0x1a   : > { %s301_s20 = sand.u32 (!%p295_p12), 1, %s1012_s25   ;;  %s824_s17 = sshll.u32 (!%p295_p12), %s794_s28, 7 }
  0x1b   : > { %298 = sbr.rel (%p295_p12) target bundleno = 925 (0x39d), region = 85  ;;  %s1131_s23 = sshll.u32 (!%p295_p12), %s301_s20, 4 }
  0x1c   : > { %s303_s9 = scalar_lea.vmem (!%p295_p12), [#allocation2], %s1131_s23  ;;  %s331_s15 = scalar_lea.vmem (!%p295_p12), [#allocation3], %s1131_s23 }
  0x1d   : > { %s727_s16 = sshll.u32 (!%p295_p12), %s331_s15, 4  ;;  %s1218_s21 = scalar_lea.hbm (!%p295_p12), %s1270_s7, %s824_s17  ;;  %s1213_s16 = int_to_ptr.vmem [resolvable:$true] %s727_s16 }
  0x1e   : > { %s1222_s23 = scalar_lea.sflag (!%p295_p12), [#allocation4], %s301_s20  ;;  %s960_s28 = scalar_lea.vmem (!%p295_p12), %s1213_s16, 256 }
  0x1f   : > { %p961_p13 = scmp.ne.s32.totalorder (!%p295_p12), %s1213_s16, %s960_s28  ;;  %s1025_s22 = smov (!%p295_p12), [#allocation3]  }
  0x20   : > { %v929_v4 = vld [vmem:[%s1264_s1] sm:$0xff]   ;;  %vm387_vm0 = vcmask 261120   ;;  %v343_v5 = vld [vmem:[%s1265_s2 + $0x10] sm:$0xff]  ;;  %v1138_v6 = vld [vmem:[%s303_s9 + $0x8] sm:$0xff]   ;;  %v1022_v7 = vmov 0   ;;  %v1023_v63 = vmov 0.0  }
  0x21   : > { %848 = vmatprep.mubr.msk.bf16.mxu0 %vm387_vm0, %v929_v4  ;;  %925 = vset.pattern.permute.xlu0 %v1022_v7  ;;  %v1140_v8 = vld [vmem:[%s303_s9] sm:$0xff]   ;;  %v344_v9 = vld [vmem:[%s1265_s2 + $0x18] sm:$0xff]  ;;  %v342_v11 = vld [vmem:[%s1265_s2 + $0x8] sm:$0xff]  ;;  %vm1024_vm1 = vmmov 0   ;;  %vm667_vm2 = vcmask 523264   ;;  %p962_p0 = pnand %p961_p13, %p1107_p6  ;;  %s964_s29 = sshll.u32 %s1025_s22, 4  ;;  %s965_s29 = int_to_ptr.vmem [resolvable:$false] %s964_s29 }
  0x22   : > { %926 = vset.pattern.permute.xlu1 %v1022_v7  ;;  %357 = vperm.xlu0 %925, %v343_v5   ;;  %v341_v10 = vld [vmem:[%s1265_s2] sm:$0xff]  ;;  %v930_v12 = vld [vmem:[%s1264_s1 + $0x8] sm:$0xff]   ;;  %v449_v13 = vld [vmem:[%s1267_s4 + $0x10] sm:$0xff]  ;;  %s966_s8 = scalar_lea.vmem %s965_s29, 512  ;;  %p967_p2 = scmp.lt.s32.totalorder %s1213_s16, %s965_s29 }
  0x23   : > { %844 = vmatprep.subr.bf16.mxu0 %v1138_v6  ;;  %347 = vperm.xlu1 %926, %v341_v10   ;;  %v450_v14 = vld [vmem:[%s1267_s4 + $0x18] sm:$0xff]  ;;  %v447_v15 = vld [vmem:[%s1267_s4] sm:$0xff]  ;;  %v448_v16 = vld [vmem:[%s1267_s4 + $0x8] sm:$0xff]  ;;  %p963_p1 = pneg %p962_p0  ;;  %p968_p3 = scmp.lt.s32.totalorder %s966_s8, %s960_s28 }
  0x24   : > { %845 = vmatpush3.bf16.msra.mxu0 %v1138_v6  ;;  %v453_v17 = vld [vmem:[%s1267_s4 + $0x30] sm:$0xff]  ;;  %v454_v18 = vld [vmem:[%s1267_s4 + $0x38] sm:$0xff]  ;;  %v451_v19 = vld [vmem:[%s1267_s4 + $0x20] sm:$0xff] }
  0x25   : > { %846 = vmatprep.subr.bf16.mxu0 %v1140_v8  ;;  %v452_v20 = vld [vmem:[%s1267_s4 + $0x28] sm:$0xff]  ;;  %v650_v21 = vld [vmem:[%s1269_s6] sm:$0xff]  ;;  %v933_v43 = vld [vmem:[%s1266_s3 + $0x10] sm:$0xff]   ;;  %p969_p4 = por %p968_p3, %p967_p2 }
  0x26   : > { %362 = vperm.xlu0 %925, %v344_v9   ;;  %v651_v22 = vld [vmem:[%s1269_s6 + $0x8] sm:$0xff]  ;;  %v931_v23 = vld [vmem:[%s1266_s3] sm:$0xff]   ;;  %v934_v62 = vld [vmem:[%s1266_s3 + $0x18] sm:$0xff]  }
  0x27   : > { %352 = vperm.xlu1 %926, %v342_v11   ;;  %856 = vmatprep.mubr.msk.bf16.mxu1 %vm387_vm0, %v931_v23  ;;  %v932_v42 = vld [vmem:[%s1266_s3 + $0x8] sm:$0xff]   ;;  %p970_p5 = pnand %p969_p4, %p963_p1 }
  0x28   : > { %847 = vmatpush3.bf16.msra.mxu0 %v1140_v8 }
  0x2a   : > { %473 = vperm.xlu0 %925, %v449_v13  }
  0x2b   : > { %849 = vmatmul.mubr.msk.bf16.vlgmr.msra.gmra.mxu0 %vm387_vm0, %v930_v12  ;;  %478 = vperm.xlu1 %926, %v450_v14  }
  0x2c   : > { %864 = vmatprep.mubr.msk.bf16.mxu0 %vm387_vm0, %v933_v43 }
  0x2e   : > { %463 = vperm.xlu0 %925, %v447_v15  }
  0x2f   : > { %468 = vperm.xlu1 %926, %v448_v16  }
  0x32   : > { %569 = vperm.xlu0 %925, %v453_v17  }
  0x33   : > { %574 = vperm.xlu1 %926, %v454_v18   ;;  %v935_v18 = vld [vmem:[%s1268_s5] sm:$0xff]  }
  0x36   : > { %559 = vperm.xlu0 %925, %v451_v19  }
  0x37   : > { %564 = vperm.xlu1 %926, %v452_v20  }
  0x3a   : > { %654 = vperm.xlu0 %925, %v650_v21  }
  0x3b   : > { %659 = vperm.xlu1 %926, %v651_v22  }
  0x9d   : > { %v358_v24 = vpop.permute.xlu0 %357 }
  0x9e   : > { %v348_v25 = vpop.permute.xlu1 %347 }
  0xa1   : > { %v363_v29 = vpop.permute.xlu0 %362 }
  0xa2   : > { %v353_v33 = vpop.permute.xlu1 %352 }
  0xa5   : > { %v474_v44 = vpop.permute.xlu0 %473 }
  0xa6   : > { %v479_v45 = vpop.permute.xlu1 %478 }
  0xa9   : > { %v464_v49 = vpop.permute.xlu0 %463 }
  0xaa   : > { %v469_v53 = vpop.permute.xlu1 %468 }
  0xad   : > { %v570_v0 = vpop.permute.xlu0 %569 }
  0xae   : > { %v575_v1 = vpop.permute.xlu1 %574 }
  0xb1   : > { %v560_v7 = vpop.permute.xlu0 %559 }
  0xb2   : > { %v565_v10 = vpop.permute.xlu1 %564 }
  0xb5   : > { %v655_v19 = vpop.permute.xlu0 %654 }
  0xb6   : > { %v660_v23 = vpop.permute.xlu1 %659 }
  0xeb   : > { %v850_v26 = vpop.f32.mrf.mxu0 }
  0xec   : > { %v437_v27 = vadd.f32 %v850_v26, %v358_v24 }
  0xed   : > { %v428_v28 = vpop.f32.mrf.mxu0 }
  0xee   : > { %v429_v30 = vadd.f32 %v428_v28, %v348_v25  ;;  %936 = vtanh.f32 %v437_v27 }
  0xef   : > { %v851_v31 = vpop.f32.mrf.mxu0 }
  0xf0   : > { %v440_v32 = vadd.f32 %v851_v31, %v363_v29 }
  0xf1   : > { %v431_v34 = vpop.f32.mrf.mxu0 }
  0xf2   : > { %938 = vtanh.f32 %v440_v32  ;;  %v432_v35 = vadd.f32 %v431_v34, %v353_v33 }
  0xf3   : > { %940 = vtanh.f32 %v429_v30 }
  0xf4   : > { %942 = vtanh.f32 %v432_v35 }
  0xfb   : > { %v937_v36 = vpop.eup %936 }
  0xff   : > { %v939_v37 = vpop.eup %938 }
 0x100   : > { %v941_v38 = vpop.eup %940  ;;  %v460_v39 = vpack.c.bf16 %v939_v37, %v937_v36 }
 0x101   : > { %v943_v40 = vpop.eup %942 }
 0x102   : > { %852 = vmatprep.subr.bf16.mxu1 %v460_v39  ;;  %v459_v41 = vpack.c.bf16 %v943_v40, %v941_v38 }
 0x103   : > { %853 = vmatpush3.bf16.msra.mxu1 %v460_v39 }
 0x104   : > { %854 = vmatprep.subr.bf16.mxu1 %v459_v41 }
 0x107   : > { %855 = vmatpush3.bf16.msra.mxu1 %v459_v41 }
 0x108   : > { %868 = vmatprep.subr.bf16.mxu1 %v1023_v63 }
 0x10a   : > { %857 = vmatmul.mubr.msk.bf16.vlgmr.msra.gmra.mxu1 %vm387_vm0, %v932_v42 }
 0x10b   : > { %869 = vmatpush3.bf16.msra.mxu1 %v1138_v6  ;;  %876 = vmatprep.mubr.msk.bf16.mxu1 %vm1024_vm1, %v1023_v63 }
 0x10c   : > { %870 = vmatprep.subr.bf16.mxu1 %v1023_v63 }
 0x10f   : > { %871 = vmatpush3.bf16.msra.mxu1 %v1140_v8 }
 0x110   : > { %872 = vmatprep.subr.bf16.mxu1 %v1023_v63 }
 0x1ca   : > { %v858_v46 = vpop.f32.mrf.mxu1 }
 0x1cb   : > { %v540_v47 = vadd.f32 %v858_v46, %v474_v44 }
 0x1cc   : > { %v531_v48 = vpop.f32.mrf.mxu1 }
 0x1cd   : > { %v532_v50 = vadd.f32 %v531_v48, %v464_v49  ;;  %944 = vtanh.f32 %v540_v47 }
 0x1ce   : > { %v859_v51 = vpop.f32.mrf.mxu1 }
 0x1cf   : > { %v543_v52 = vadd.f32 %v859_v51, %v479_v45 }
 0x1d0   : > { %v534_v54 = vpop.f32.mrf.mxu1 }
 0x1d1   : > { %946 = vtanh.f32 %v543_v52  ;;  %v535_v55 = vadd.f32 %v534_v54, %v469_v53 }
 0x1d2   : > { %948 = vtanh.f32 %v532_v50 }
 0x1d3   : > { %950 = vtanh.f32 %v535_v55 }
 0x1da   : > { %v945_v56 = vpop.eup %944 }
 0x1de   : > { %v947_v57 = vpop.eup %946 }
 0x1df   : > { %v949_v58 = vpop.eup %948  ;;  %v556_v59 = vpack.c.bf16 %v947_v57, %v945_v56 }
 0x1e0   : > { %v951_v60 = vpop.eup %950 }
 0x1e1   : > { %860 = vmatprep.subr.bf16.mxu0 %v556_v59  ;;  %v555_v61 = vpack.c.bf16 %v951_v60, %v949_v58 }
 0x1e2   : > { %861 = vmatpush3.bf16.msra.mxu0 %v556_v59 }
 0x1e3   : > { %862 = vmatprep.subr.bf16.mxu0 %v555_v61 }
 0x1e6   : > { %863 = vmatpush3.bf16.msra.mxu0 %v555_v61 }
 0x1e9   : > { %865 = vmatmul.mubr.msk.bf16.vlgmr.msra.gmra.mxu0 %vm387_vm0, %v934_v62 }
 0x2a9   : > { %v866_v2 = vpop.f32.mrf.mxu0 }
 0x2aa   : > { %v636_v3 = vadd.f32 %v866_v2, %v570_v0 }
 0x2ab   : > { %v627_v4 = vpop.f32.mrf.mxu0 }
 0x2ac   : > { %952 = vtanh.f32 %v636_v3  ;;  %v628_v12 = vadd.f32 %v627_v4, %v560_v7 }
 0x2ad   : > { %v867_v5 = vpop.f32.mrf.mxu0 }
 0x2ae   : > { %v639_v9 = vadd.f32 %v867_v5, %v575_v1 }
 0x2af   : > { %v630_v11 = vpop.f32.mrf.mxu0 }
 0x2b0   : > { %954 = vtanh.f32 %v639_v9  ;;  %v631_v6 = vadd.f32 %v630_v11, %v565_v10 }
 0x2b2   : > { %956 = vtanh.f32 %v631_v6 }
 0x2b3   : > { %958 = vtanh.f32 %v628_v12 }
 0x2b9   : > { %v953_v8 = vpop.eup %952 }
 0x2bd   : > { %v955_v13 = vpop.eup %954 }
 0x2be   : > { %v647_v14 = vpack.c.bf16 %v955_v13, %v953_v8 }
 0x2bf   : > { %v957_v15 = vpop.eup %956 }
 0x2c0   : > { %873 = vmatpush3.bf16.msra.mxu1 %v647_v14  ;;  %v959_v16 = vpop.eup %958 }
 0x2c1   : > { %874 = vmatprep.subr.bf16.mxu1 %v1023_v63  ;;  %v646_v17 = vpack.c.bf16 %v957_v15, %v959_v16 }
 0x2c4   : > { %875 = vmatpush3.bf16.msra.mxu1 %v646_v17 }
 0x2c7   : > { %877 = vmatmul.mubr.msk.bf16.vlgmr.msra.gmra.mxu1 %vm667_vm2, %v935_v18 }
 0x387   : > { %v705_v20 = vpop.f32.mrf.mxu1 }
 0x388   : > { %v706_v21 = vadd.f32 %v705_v20, %v655_v19 }
 0x389   : > { %v878_v22 = vpop.f32.mrf.mxu1 }
 0x38a   : > { %712 = vst [vmem:[%s331_s15] sm:$0xff] %v706_v21 }
 0x38b   : > { %v708_v24 = vpop.f32.mrf.mxu1 }
 0x38c   : > { %v709_v25 = vadd.f32 %v708_v24, %v660_v23 }
 0x38d   : > { %v879_v26 = vpop.f32.mrf.mxu1 }
 0x38e   : > { %713 = vst [vmem:[%s331_s15 + $0x8] sm:$0xff] %v709_v25 }
 0x38f   : > { %973 = shalt.err (!%p970_p5)
}
 0x390   : > { %s974_s20 = scalar_lea.hbm %s1218_s21, 256  ;;  %s978_s14 = scalar_lea.hbm %s1270_s7, 512 }
 0x391   : > { %p975_p7 = scmp.ne.s32.totalorder %s1218_s21, %s974_s20  ;;  %p979_p12 = scmp.lt.s32.totalorder %s1218_s21, %s1270_s7 }
 0x392   : > { %p980_p13 = scmp.lt.s32.totalorder %s978_s14, %s974_s20 }
 0x393   : > { %p976_p10 = pnand %p975_p7, %p1107_p6 }
 0x394   : > { %p981_p0 = por %p980_p13, %p979_p12 }
 0x395   : > { %p977_p11 = pneg %p976_p10 }
 0x397   : > { %p982_p1 = pnand %p981_p0, %p977_p11 }
 0x399   : > { %985 = shalt.err (!%p982_p1)
}
 0x39a   : > { %s1026_s18 = smov 128   ;;  %s1027_s19 = smov 256  }
 0x39b   : > { %s1028_s28 = smov 8  }
 0x39c   : > { %880 = dma.vmem_to_hbm [thread:$0]  (%p1107_p6), %s1213_s16, 256, %s1218_s21, %s1222_s23, %s1026_s18, %s1027_s19, %s1028_s28  }
 0x39d PF: > { %s742_s22 = sand.u32 1, %s1008_s24   ;;  %p883_p2 = pnand %p797_p9, %p1111_p8 }
 0x39e   : > { %s743_s29 = scalar_lea.sflag [#allocation4], %s742_s22 }
 0x39f   : > { %p884_p3 = pneg %p883_p2 }
 0x3a1   : > { %1003 = dma.done.wait (%p884_p3), %s743_s29, 256  }
 0x3a2   : > { %1005 = vsyncadd (%p884_p3), %s743_s29, 4294967040  ;;  %p17_p4 = scmp.ge.s32.totalorder %s1092_s30, 4   ;;  %s1273_s24 = smov %s1012_s25 }
 0x3a3   : > { %s1274_s25 = smov %s1016_s26  ;;  %s1275_s26 = smov %s1105_s10 }
 0x3a4   : > { %s1276_s27 = smov %s1092_s30  ;;  %19 = sbr.rel (!%p17_p4) target bundleno = 3 (0x3), region = 130 }
 0x3a9   :  { %748 = vsyncpa [#allocation4], 1 }
 0x3aa   :  { %750 = vsyncpa [#allocation4 + $0x1], 1 }

</bundles_post_ra>
